<compile_context>
chip_gen: v6e
topology: v6e:2x2x1
jax: 0.10.0
libtpu: 0.0.40
codegen_flags: <defaults>
</compile_context>

<pallas_src>
import math

import jax
import jax.numpy as jnp
from jax.experimental import pallas as pl
from jax.experimental.pallas import tpu as pltpu

_LANE = 128


def _round_up(v, m):
    return ((v + m - 1) // m) * m


def _make_mxu_kernel(activation, cast_bf16):
    def kernel(x_ref, w_ref, b_ref, o_ref):
        # x_ref: (C_in, TL), w_ref: (C_out, C_in), b_ref: (C_out, 1), o_ref: (C_out, TL)
        x = x_ref[...]
        w = w_ref[...]
        if cast_bf16:
            # Explicit single-pass bf16 MXU (f32 accumulation) instead of the
            # implicit multi-pass f32 lowering; enabled only for large C_in.
            x = x.astype(jnp.bfloat16)
            w = w.astype(jnp.bfloat16)
        acc = jnp.dot(w, x, preferred_element_type=jnp.float32)
        acc = acc + b_ref[...]
        if activation == "relu":
            acc = jnp.maximum(acc, 0.0)
        o_ref[...] = acc.astype(o_ref.dtype)

    return kernel


def _make_vpu_kernel(activation):
    def kernel(x_ref, w_ref, b_ref, o_ref):
        # Tiny-channel path: a (C_out, C_in) x (C_in, TL) product with
        # C_out, C_in < 8 uses <1% of an MXU pass; do the handful of
        # broadcast-MACs on the VPU instead.
        c_out, c_in = w_ref.shape
        x = x_ref[...].astype(jnp.float32)
        w = w_ref[...].astype(jnp.float32)
        acc = jnp.zeros(o_ref.shape, jnp.float32)
        for ci in range(c_in):  # static, tiny unroll
            acc = acc + w[:, ci:ci + 1] * x[ci:ci + 1, :]
        acc = acc + b_ref[...].astype(jnp.float32)
        if activation == "relu":
            acc = jnp.maximum(acc, 0.0)
        o_ref[...] = acc.astype(o_ref.dtype)

    return kernel


def _choose_tl(L, c_in, c_out, itemsize, n_batch, w_bufs_bytes,
               target_tile_bytes=3 << 20, vmem_budget_bytes=12 << 20):
    """Pick the L-tile length (multiple of 128 lanes).

    Aims for ~2-4 MiB of (x + out) tile bytes per grid step (per-step overhead
    is ~0.35 us, so small-channel shapes need long tiles to stay HBM-bound),
    while keeping the double-buffered working set (x/out tiles + weight + bias)
    under a conservative budget that fits v5e's 16 MiB default scoped VMEM and
    leaves headroom on v7x's 64 MiB.  When N == 1 the tile is capped so the L
    grid axis still has >= 2 tiles (keeps both v7x TensorCores busy).
    """
    l_cap = _round_up(L, _LANE)
    bytes_per_lane = (c_in + c_out) * itemsize
    tl = (target_tile_bytes // bytes_per_lane) // _LANE * _LANE
    tl = max(_LANE, min(tl, l_cap))
    if n_batch < 2 and l_cap > _LANE:
        tl = min(tl, _round_up(pl.cdiv(L, 2), _LANE))

    def working_set(t):
        return 2 * bytes_per_lane * t + w_bufs_bytes + 2 * c_out * 4

    while tl > _LANE and working_set(tl) > vmem_budget_bytes:
        tl -= _LANE
    return tl, working_set(tl)


def conv1x1_forward(x, weight, bias, *, tl=None, activation=None, mxu_bf16=None):
    """Pointwise Conv1d forward.

    x: (N, C_in, L), weight: (C_out, C_in, 1) (PyTorch layout), bias: (C_out,)
    activation: None | "relu"  (optional fused pointwise epilogue)
    Returns (N, C_out, L) in x.dtype.
    """
    N, C_in, L = x.shape
    C_out, C_in_w, K = weight.shape
    assert K == 1, "only kernel_size == 1 (pointwise) Conv1d is supported here"
    # TODO(synk): kernel_size > 1 SingleConvs (model_cfg.kernel_size > 1) need
    # halo'd L-tiles and are not implemented in this kernel.
    assert C_in_w == C_in
    assert activation in (None, "relu")

    w2d = weight.reshape(C_out, C_in).astype(x.dtype)
    b2d = bias.reshape(C_out, 1).astype(jnp.float32)   # f32 bias, added per tile

    itemsize = jnp.dtype(x.dtype).itemsize
    # Budget the weight at 2 buffers (in case single-buffering is unavailable).
    w_bufs_bytes = 2 * C_out * C_in * itemsize

    if tl is None:
        tl, working_set = _choose_tl(L, C_in, C_out, itemsize, N, w_bufs_bytes)
    else:
        tl = max(_LANE, _round_up(tl, _LANE))
        working_set = 2 * (C_in + C_out) * tl * itemsize + w_bufs_bytes + 2 * C_out * 4

    grid = (N, pl.cdiv(L, tl))

    # Raise the scoped VMEM limit only if the working set needs it; cap at
    # 48 MiB to leave compiler-scratch headroom on v7x's 64 MiB VMEM/TC.
    vmem_limit = None
    if working_set > (12 << 20):
        vmem_limit = int(min(working_set + (4 << 20), 48 << 20))

    if mxu_bf16 is None:
        mxu_bf16 = bool(x.dtype == jnp.float32 and C_in >= 512)

    use_vpu = max(C_in, C_out) < 8
    kernel = _make_vpu_kernel(activation) if use_vpu else _make_mxu_kernel(activation, mxu_bf16)

    cost = pl.CostEstimate(
        flops=2 * N * C_out * C_in * L,
        transcendentals=0,
        bytes_accessed=(N * (C_in + C_out) * L + C_out * C_in) * itemsize + C_out * 4,
    )

    def call(single_buffer_params):
        wb_kwargs = dict(pipeline_mode=pl.Buffered(1)) if single_buffer_params else {}
        return pl.pallas_call(
            kernel,
            out_shape=jax.ShapeDtypeStruct((N, C_out, L), x.dtype),
            grid=grid,
            in_specs=[
                pl.BlockSpec((None, C_in, tl), lambda n, l: (n, 0, l)),        # x tile
                pl.BlockSpec((C_out, C_in), lambda n, l: (0, 0), **wb_kwargs),  # weight
                pl.BlockSpec((C_out, 1), lambda n, l: (0, 0), **wb_kwargs),     # bias
            ],
            out_specs=pl.BlockSpec((None, C_out, tl), lambda n, l: (n, 0, l)),
            compiler_params=pltpu.CompilerParams(
                dimension_semantics=("parallel", "parallel"),
                vmem_limit_bytes=vmem_limit,
            ),
            cost_estimate=cost,
        )(x, w2d, b2d)

    try:
        # Weight/bias have a constant index_map and are fetched once: single
        # buffer them so the saved VMEM can go into a larger L tile.
        return call(True)
    except Exception:
        return call(False)   # fall back if Buffered(1) is not supported


if __name__ == "__main__":
    key = jax.random.PRNGKey(0)

    def init_conv1x1(k, c_in, c_out):
        kw, kb = jax.random.split(k)
        bound = 1.0 / math.sqrt(c_in)        # PyTorch Conv1d default init range
        w = jax.random.uniform(kw, (c_out, c_in, 1), jnp.float32, -bound, bound)
        b = jax.random.uniform(kb, (c_out,), jnp.float32, -bound, bound)
        return w, b

    def ref(x, w, b):
        return jnp.einsum("oc,ncl->nol", w[:, :, 0].astype(jnp.float32),
                          x.astype(jnp.float32)) + b[None, :, None]

    ok = True

    # 1) Tiny-channel VPU path, L=16 handled as one ragged (masked-store) tile.
    k0, k1 = jax.random.split(key)
    x = jax.random.normal(k0, (2, 4, 16), jnp.float32)
    w, b = init_conv1x1(k1, 4, 3)
    out = jax.block_until_ready(conv1x1_forward(x, w, b))
    ok &= out.shape == (2, 3, 16)
    ok &= bool(jnp.allclose(out, ref(x, w, b), atol=1e-5, rtol=1e-5))

    # 2) cls-head-like shapes (C_in=64 -> C_out=1), MXU path, non-aligned L=300
    #    (no wrapper pad/slice: ragged boundary tile is masked by Pallas).
    k2, k3 = jax.random.split(k1)
    x2 = jax.random.normal(k2, (2, 64, 300), jnp.float32)
    w2, b2 = init_conv1x1(k3, 64, 1)
    out2 = jax.block_until_ready(conv1x1_forward(x2, w2, b2))
    ok &= out2.shape == (2, 1, 300)
    ok &= bool(jnp.allclose(out2, ref(x2, w2, b2), atol=1e-4, rtol=1e-4))

    # 3) bf16 I/O from the producer (no wrapper-side cast), f32 accumulation.
    x2_bf16 = x2.astype(jnp.bfloat16)
    out3 = jax.block_until_ready(conv1x1_forward(x2_bf16, w2, b2))
    ok &= out3.dtype == jnp.bfloat16
    ok &= bool(jnp.allclose(out3.astype(jnp.float32), ref(x2_bf16, w2, b2),
                            atol=5e-2, rtol=5e-2))

    # 4) Multi-tile L grid (explicit TL=128 -> grid=(2, 2)) on the MXU path.
    k4, k5 = jax.random.split(k3)
    x4 = jax.random.normal(k4, (2, 8, 256), jnp.float32)
    w4, b4 = init_conv1x1(k5, 8, 8)
    out4 = jax.block_until_ready(conv1x1_forward(x4, w4, b4, tl=128))
    ok &= out4.shape == (2, 8, 256)
    ok &= bool(jnp.allclose(out4, ref(x4, w4, b4), atol=1e-4, rtol=1e-4))

    # 5) Fused ReLU epilogue (free on the idle VALU slot of this DMA-bound op).
    out5 = jax.block_until_ready(conv1x1_forward(x4, w4, b4, activation="relu"))
    ok &= bool(jnp.allclose(out5, jnp.maximum(ref(x4, w4, b4), 0.0),
                            atol=1e-4, rtol=1e-4))

    # 6) N=1: auto-TL keeps >= 2 L-tiles so both v7x TensorCores get work.
    k6, k7 = jax.random.split(k5)
    x6 = jax.random.normal(k6, (1, 16, 512), jnp.float32)
    w6, b6 = init_conv1x1(k7, 16, 32)
    out6 = jax.block_until_ready(conv1x1_forward(x6, w6, b6))
    ok &= out6.shape == (1, 32, 512)
    ok &= bool(jnp.allclose(out6, ref(x6, w6, b6), atol=1e-4, rtol=1e-4))

    if not ok:
        raise SystemExit("mismatch vs reference")
    print("KERNEL_OK")
</pallas_src>

<mosaic_0001>
module attributes {stable_mosaic.version = 11 : i64} {
  func.func @kernel(%arg0: i32, %arg1: i32, %arg2: memref<1x4x128xf32, #tpu.memory_space<vmem>>, %arg3: memref<3x4xf32, #tpu.memory_space<vmem>>, %arg4: memref<3x1xf32, #tpu.memory_space<vmem>>, %arg5: memref<1x3x128xf32, #tpu.memory_space<vmem>>) attributes {dimension_semantics = [#tpu.dimension_semantics<parallel>, #tpu.dimension_semantics<parallel>], iteration_bounds = array<i64: 2, 1>, scalar_prefetch = 0 : i64, scratch_operands = 0 : i64, tpu.core_type = #tpu.core_type<tc>, window_params = [{transform_indices = @transform_0, window_bounds = array<i64: 1, 4, 128>}, {pipeline_mode = #tpu.pipeline_mode<synchronous>, transform_indices = @transform_1, window_bounds = array<i64: 3, 4>}, {pipeline_mode = #tpu.pipeline_mode<synchronous>, transform_indices = @transform_2, window_bounds = array<i64: 3, 1>}, {transform_indices = @transform_3, window_bounds = array<i64: 1, 3, 128>}]} {
    %c0 = arith.constant 0 : index
    %c0_0 = arith.constant 0 : index
    %c0_1 = arith.constant 0 : index
    %0 = vector.load %arg2[%c0, %c0_0, %c0_1] : memref<1x4x128xf32, #tpu.memory_space<vmem>>, vector<1x4x128xf32>
    %1 = vector.shape_cast %0 : vector<1x4x128xf32> to vector<4x128xf32>
    %c0_2 = arith.constant 0 : index
    %c0_3 = arith.constant 0 : index
    %2 = vector.load %arg3[%c0_2, %c0_3] : memref<3x4xf32, #tpu.memory_space<vmem>>, vector<3x4xf32>
    %cst = arith.constant 0.000000e+00 : f32
    %3 = vector.broadcast %cst : f32 to vector<3x128xf32>
    %4 = vector.extract_strided_slice %2 {offsets = [0, 0], sizes = [3, 1], strides = [1, 1]} : vector<3x4xf32> to vector<3x1xf32>
    %5 = vector.extract_strided_slice %1 {offsets = [0, 0], sizes = [1, 128], strides = [1, 1]} : vector<4x128xf32> to vector<1x128xf32>
    %6 = vector.broadcast %4 : vector<3x1xf32> to vector<3x128xf32>
    %7 = vector.broadcast %5 : vector<1x128xf32> to vector<3x128xf32>
    %8 = arith.mulf %6, %7 : vector<3x128xf32>
    %9 = arith.addf %3, %8 : vector<3x128xf32>
    %10 = vector.extract_strided_slice %2 {offsets = [0, 1], sizes = [3, 1], strides = [1, 1]} : vector<3x4xf32> to vector<3x1xf32>
    %11 = vector.extract_strided_slice %1 {offsets = [1, 0], sizes = [1, 128], strides = [1, 1]} : vector<4x128xf32> to vector<1x128xf32>
    %12 = vector.broadcast %10 : vector<3x1xf32> to vector<3x128xf32>
    %13 = vector.broadcast %11 : vector<1x128xf32> to vector<3x128xf32>
    %14 = arith.mulf %12, %13 : vector<3x128xf32>
    %15 = arith.addf %9, %14 : vector<3x128xf32>
    %16 = vector.extract_strided_slice %2 {offsets = [0, 2], sizes = [3, 1], strides = [1, 1]} : vector<3x4xf32> to vector<3x1xf32>
    %17 = vector.extract_strided_slice %1 {offsets = [2, 0], sizes = [1, 128], strides = [1, 1]} : vector<4x128xf32> to vector<1x128xf32>
    %18 = vector.broadcast %16 : vector<3x1xf32> to vector<3x128xf32>
    %19 = vector.broadcast %17 : vector<1x128xf32> to vector<3x128xf32>
    %20 = arith.mulf %18, %19 : vector<3x128xf32>
    %21 = arith.addf %15, %20 : vector<3x128xf32>
    %22 = vector.extract_strided_slice %2 {offsets = [0, 3], sizes = [3, 1], strides = [1, 1]} : vector<3x4xf32> to vector<3x1xf32>
    %23 = vector.extract_strided_slice %1 {offsets = [3, 0], sizes = [1, 128], strides = [1, 1]} : vector<4x128xf32> to vector<1x128xf32>
    %24 = vector.broadcast %22 : vector<3x1xf32> to vector<3x128xf32>
    %25 = vector.broadcast %23 : vector<1x128xf32> to vector<3x128xf32>
    %26 = arith.mulf %24, %25 : vector<3x128xf32>
    %27 = arith.addf %21, %26 : vector<3x128xf32>
    %c0_4 = arith.constant 0 : index
    %c0_5 = arith.constant 0 : index
    %28 = vector.load %arg4[%c0_4, %c0_5] : memref<3x1xf32, #tpu.memory_space<vmem>>, vector<3x1xf32>
    %29 = vector.broadcast %28 : vector<3x1xf32> to vector<3x128xf32>
    %30 = arith.addf %27, %29 : vector<3x128xf32>
    %c0_6 = arith.constant 0 : index
    %c0_7 = arith.constant 0 : index
    %c0_8 = arith.constant 0 : index
    %31 = vector.load %arg5[%c0_6, %c0_7, %c0_8] : memref<1x3x128xf32, #tpu.memory_space<vmem>>, vector<1x3x128xf32>
    %32 = vector.shape_cast %31 : vector<1x3x128xf32> to vector<3x128xf32>
    %33 = vector.shape_cast %30 : vector<3x128xf32> to vector<1x3x128xf32>
    tpu.vector_store %arg5[%c0_6, %c0_7, %c0_8], %33 {strides = array<i32>} : memref<1x3x128xf32, #tpu.memory_space<vmem>>, vector<1x3x128xf32>,
    return
  }
  func.func @transform_0(%arg0: i32, %arg1: i32) -> (i32, i32, i32) {
    %c0_i32 = arith.constant 0 : i32
    %c0_i32_0 = arith.constant 0 : i32
    return %arg0, %c0_i32, %arg1 : i32, i32, i32
  }
  func.func @transform_1(%arg0: i32, %arg1: i32) -> (i32, i32) {
    %c0_i32 = arith.constant 0 : i32
    %c0_i32_0 = arith.constant 0 : i32
    %c0_i32_1 = arith.constant 0 : i32
    return %c0_i32, %c0_i32_0 : i32, i32
  }
  func.func @transform_2(%arg0: i32, %arg1: i32) -> (i32, i32) {
    %c0_i32 = arith.constant 0 : i32
    %c0_i32_0 = arith.constant 0 : i32
    %c0_i32_1 = arith.constant 0 : i32
    return %c0_i32, %c0_i32_0 : i32, i32
  }
  func.func @transform_3(%arg0: i32, %arg1: i32) -> (i32, i32, i32) {
    %c0_i32 = arith.constant 0 : i32
    %c0_i32_0 = arith.constant 0 : i32
    return %arg0, %c0_i32, %arg1 : i32, i32, i32
  }
}

module attributes {stable_mosaic.version = 11 : i64} {
  func.func @kernel(%arg0: i32, %arg1: i32, %arg2: memref<1x4x128xf32, #tpu.memory_space<vmem>>, %arg3: memref<3x4xf32, #tpu.memory_space<vmem>>, %arg4: memref<3x1xf32, #tpu.memory_space<vmem>>, %arg5: memref<1x3x128xf32, #tpu.memory_space<vmem>>) attributes {dimension_semantics = [#tpu.dimension_semantics<parallel>, #tpu.dimension_semantics<parallel>], iteration_bounds = array<i64: 2, 1>, scalar_prefetch = 0 : i64, scratch_operands = 0 : i64, tpu.core_type = #tpu.core_type<tc>, window_params = [{transform_indices = @transform_0, window_bounds = array<i64: 1, 4, 128>}, {pipeline_mode = #tpu.pipeline_mode<synchronous>, transform_indices = @transform_1, window_bounds = array<i64: 3, 4>}, {pipeline_mode = #tpu.pipeline_mode<synchronous>, transform_indices = @transform_2, window_bounds = array<i64: 3, 1>}, {transform_indices = @transform_3, window_bounds = array<i64: 1, 3, 128>}]} {
    %c0 = arith.constant 0 : index
    %c0_0 = arith.constant 0 : index
    %c0_1 = arith.constant 0 : index
    %0 = vector.load %arg2[%c0, %c0_0, %c0_1] : memref<1x4x128xf32, #tpu.memory_space<vmem>>, vector<1x4x128xf32>
    %1 = vector.shape_cast %0 : vector<1x4x128xf32> to vector<4x128xf32>
    %c0_2 = arith.constant 0 : index
    %c0_3 = arith.constant 0 : index
    %2 = vector.load %arg3[%c0_2, %c0_3] : memref<3x4xf32, #tpu.memory_space<vmem>>, vector<3x4xf32>
    %cst = arith.constant 0.000000e+00 : f32
    %3 = vector.broadcast %cst : f32 to vector<3x128xf32>
    %4 = vector.extract_strided_slice %2 {offsets = [0, 0], sizes = [3, 1], strides = [1, 1]} : vector<3x4xf32> to vector<3x1xf32>
    %5 = vector.extract_strided_slice %1 {offsets = [0, 0], sizes = [1, 128], strides = [1, 1]} : vector<4x128xf32> to vector<1x128xf32>
    %6 = vector.broadcast %4 : vector<3x1xf32> to vector<3x128xf32>
    %7 = vector.broadcast %5 : vector<1x128xf32> to vector<3x128xf32>
    %8 = arith.mulf %6, %7 : vector<3x128xf32>
    %9 = arith.addf %3, %8 : vector<3x128xf32>
    %10 = vector.extract_strided_slice %2 {offsets = [0, 1], sizes = [3, 1], strides = [1, 1]} : vector<3x4xf32> to vector<3x1xf32>
    %11 = vector.extract_strided_slice %1 {offsets = [1, 0], sizes = [1, 128], strides = [1, 1]} : vector<4x128xf32> to vector<1x128xf32>
    %12 = vector.broadcast %10 : vector<3x1xf32> to vector<3x128xf32>
    %13 = vector.broadcast %11 : vector<1x128xf32> to vector<3x128xf32>
    %14 = arith.mulf %12, %13 : vector<3x128xf32>
    %15 = arith.addf %9, %14 : vector<3x128xf32>
    %16 = vector.extract_strided_slice %2 {offsets = [0, 2], sizes = [3, 1], strides = [1, 1]} : vector<3x4xf32> to vector<3x1xf32>
    %17 = vector.extract_strided_slice %1 {offsets = [2, 0], sizes = [1, 128], strides = [1, 1]} : vector<4x128xf32> to vector<1x128xf32>
    %18 = vector.broadcast %16 : vector<3x1xf32> to vector<3x128xf32>
    %19 = vector.broadcast %17 : vector<1x128xf32> to vector<3x128xf32>
    %20 = arith.mulf %18, %19 : vector<3x128xf32>
    %21 = arith.addf %15, %20 : vector<3x128xf32>
    %22 = vector.extract_strided_slice %2 {offsets = [0, 3], sizes = [3, 1], strides = [1, 1]} : vector<3x4xf32> to vector<3x1xf32>
    %23 = vector.extract_strided_slice %1 {offsets = [3, 0], sizes = [1, 128], strides = [1, 1]} : vector<4x128xf32> to vector<1x128xf32>
    %24 = vector.broadcast %22 : vector<3x1xf32> to vector<3x128xf32>
    %25 = vector.broadcast %23 : vector<1x128xf32> to vector<3x128xf32>
    %26 = arith.mulf %24, %25 : vector<3x128xf32>
    %27 = arith.addf %21, %26 : vector<3x128xf32>
    %c0_4 = arith.constant 0 : index
    %c0_5 = arith.constant 0 : index
    %28 = vector.load %arg4[%c0_4, %c0_5] : memref<3x1xf32, #tpu.memory_space<vmem>>, vector<3x1xf32>
    %29 = vector.broadcast %28 : vector<3x1xf32> to vector<3x128xf32>
    %30 = arith.addf %27, %29 : vector<3x128xf32>
    %c0_6 = arith.constant 0 : index
    %c0_7 = arith.constant 0 : index
    %c0_8 = arith.constant 0 : index
    %31 = vector.load %arg5[%c0_6, %c0_7, %c0_8] : memref<1x3x128xf32, #tpu.memory_space<vmem>>, vector<1x3x128xf32>
    %32 = vector.shape_cast %31 : vector<1x3x128xf32> to vector<3x128xf32>
    %33 = vector.shape_cast %30 : vector<3x128xf32> to vector<1x3x128xf32>
    tpu.vector_store %arg5[%c0_6, %c0_7, %c0_8], %33 {strides = array<i32>} : memref<1x3x128xf32, #tpu.memory_space<vmem>>, vector<1x3x128xf32>,
    return
  }
  func.func @transform_0(%arg0: i32, %arg1: i32) -> (i32, i32, i32) {
    %c0_i32 = arith.constant 0 : i32
    %c0_i32_0 = arith.constant 0 : i32
    return %arg0, %c0_i32, %arg1 : i32, i32, i32
  }
  func.func @transform_1(%arg0: i32, %arg1: i32) -> (i32, i32) {
    %c0_i32 = arith.constant 0 : i32
    %c0_i32_0 = arith.constant 0 : i32
    %c0_i32_1 = arith.constant 0 : i32
    return %c0_i32, %c0_i32_0 : i32, i32
  }
  func.func @transform_2(%arg0: i32, %arg1: i32) -> (i32, i32) {
    %c0_i32 = arith.constant 0 : i32
    %c0_i32_0 = arith.constant 0 : i32
    %c0_i32_1 = arith.constant 0 : i32
    return %c0_i32, %c0_i32_0 : i32, i32
  }
  func.func @transform_3(%arg0: i32, %arg1: i32) -> (i32, i32, i32) {
    %c0_i32 = arith.constant 0 : i32
    %c0_i32_0 = arith.constant 0 : i32
    return %arg0, %c0_i32, %arg1 : i32, i32, i32
  }
}

</mosaic_0001>

<bundles_post_ra>
// kernel: tpu_custom_call.1
= control target key start
LH: loop header
LB: loop body
LE: loop exit
PB: predicated region body
PF: predicated region fallthrough
CT: control target
= control target key end

     0   :  { %8 = vsyncpa [#allocation3], 0  ;;  %s631_s0 = inlined_call_operand.hbm [shape: f32[2,4,16], index: 0, kind: input, shape index: {}]   ;;  %s632_s1 = inlined_call_operand.vmem [shape: f32[3,4], index: 1, kind: input, shape index: {}]   ;;  %s633_s2 = inlined_call_operand.vmem [shape: f32[3,1], index: 2, kind: input, shape index: {}]   ;;  %s634_s3 = inlined_call_operand.vmem [shape: f32[2,3,16], index: 3, kind: output, shape index: {}]  }
   0x1   :  { %10 = vsyncpa [#allocation3 + $0x1], 0  ;;  %s525_s12 = smov 0   ;;  %s527_s13 = smov 0  }
   0x2   :  { %s529_s14 = smov 0   ;;  %s531_s15 = smov 0  }
   0x3   :  { %s533_s16 = smov 0   ;;  %s535_s17 = smov 0  }
   0x4 LB: > { %s344_s18 = sadd.s32 4294967295, %s498_s17   ;;  %s28_s19 = sadd.s32 1, %s494_s16  ;;  %s498_s17 = sphi %s535_s17, %s16_s17   ;;  %s494_s16 = sphi %s533_s16, %s642_s16   ;;  %s490_s15 = sphi %s531_s15, %s641_s15   ;;  %s486_s14 = sphi %s529_s14, %s640_s14   ;;  %s482_s13 = sphi %s527_s13, %s639_s13   ;;  %s478_s12 = sphi %s525_s12, %s638_s12  }
   0x5   : > { %p30_p0 = scmp.ge.s32.totalorder %s28_s19, 2  ;;  %s37_s20 = sadd.s32 1, %s486_s14 }
   0x6   : > { %p44_p1 = scmp.ne.s32.totalorder %s486_s14, %s482_s13  ;;  %p45_p2 = scmp.eq.s32.totalorder %s498_s17, 0 }
   0x7   : > { %s644_s19 = smov (%p30_p0, %s28_s19), 0  ;;  %p50_p4 = scmp.ne.s32.totalorder %s482_s13, %s478_s12 }
   0x8   : > { %p561_p3 = por %p45_p2, %p44_p1  ;;  %s32_s22 = ssub.s32 %s494_s16, %s644_s19 }
   0x9   : > { %p51_p5 = scmp.eq.s32.totalorder %s344_s18, 0  ;;  %p35_p6 = scmp.eq.s32.totalorder %s32_s22, 0 }
   0xa   : > { %p361_p8 = scmp.lt.s32.totalorder %s498_s17, 2  ;;  %s150_s25 = sand.u32 1, %s486_s14  }
   0xb   : > { %p568_p7 = por %p51_p5, %p50_p4  ;;  %s349_s26 = sshll.u32 %s494_s16, 6 }
   0xc   : > { %s574_s24 = scalar_select %p35_p6, %s486_s14, %s37_s20  }
   0xd   : > { %s348_s27 = sshll.u32 %s150_s25, 2  ;;  %s160_s30 = scalar_lea.hbm %s631_s0, %s349_s26 }
   0xe   : > { %s154_s4 = scalar_lea.vmem [#allocation2], %s348_s27  ;;  %p583_p9 = pnand %p361_p8, %p561_p3 }
   0xf   : > { %s162_s5 = sshll.u32 %s154_s4, 4  ;;  %p350_p10 = scmp.ge.s32.totalorder %s498_s17, 1  ;;  %s163_s5 = int_to_ptr.vmem [resolvable:$true] %s162_s5 }
  0x10   : > { %p167_p11 = scmp.lt.s32.totalorder %s498_s17, 3  ;;  %s151_s7 = scalar_lea.sflag [#allocation3], %s150_s25 }
  0x11   : > { %p422_p12 = pneg %p583_p9  ;;  %s433_s8 = scalar_lea.vmem %s163_s5, 64 }
  0x12   : > { %p434_p13 = scmp.ne.s32.totalorder %s163_s5, %s433_s8  ;;  %s500_s9 = smov [#allocation2]  }
  0x13   : > { %s438_s10 = sshll.u32 %s500_s9, 4  ;;  %s439_s10 = int_to_ptr.vmem [resolvable:$false] %s438_s10 }
  0x14   : > { %p436_p0 = pnand %p434_p13, %p422_p12  ;;  %s440_s11 = scalar_lea.vmem %s439_s10, 128 }
  0x15   : > { %p441_p2 = scmp.lt.s32.totalorder %s163_s5, %s439_s10  ;;  %p442_p3 = scmp.lt.s32.totalorder %s440_s11, %s433_s8 }
  0x16   : > { %p437_p1 = pneg %p436_p0 }
  0x17   : > { %p443_p4 = por %p442_p3, %p441_p2 }
  0x19   : > { %p444_p5 = pnand %p443_p4, %p437_p1 }
  0x1b   : > { %447 = shalt.err (!%p444_p5)
}
  0x1c   : > { %360 = dma.hbm_to_vmem [thread:$0]  (!%p583_p9), %s160_s30, 64, %s163_s5, %s151_s7  }
  0x1d   : > { %p168_p6 = pnand %p350_p10, %p167_p11 }
  0x1e   : > { %s173_s12 = sand.u32 (!%p168_p6), 1, %s482_s13  }
  0x1f   : > { %171 = sbr.rel (%p168_p6) target bundleno = 179 (0xb3), region = 32  ;;  %s351_s18 = sshll.u32 (!%p168_p6), %s173_s12, 2 }
  0x20   : > { %s174_s20 = scalar_lea.sflag (!%p168_p6), [#allocation3], %s173_s12  ;;  %s177_s21 = scalar_lea.vmem (!%p168_p6), [#allocation2], %s351_s18 }
  0x24   : > { %473 = dma.done.wait (%p568_p7), %s174_s20, 64  }
  0x25   : > { %475 = vsyncadd (%p568_p7), %s174_s20, 4294967232  ;;  %v501_v0 = vmov 0   ;;  %v502_v1 = vmov 2   ;;  %v210_v2 = vld [vmem:[%s632_s1] sm:$0x7]  ;;  %v503_v3 = vmov 1   ;;  %v216_v6 = vlaneseq }
  0x26   : > { %414 = vset.pattern.permute.xlu0 %v501_v0  ;;  %416 = vset.pattern.permute.xlu1 %v502_v1  ;;  %v504_v4 = vmov 3   ;;  %v252_v5 = vld [vmem:[%s633_s2] sm:$0x7]  ;;  %p202_p7 = scmp.lt.s32.totalorder %s490_s15, 1 }
  0x27   : > { %213 = vperm.xlu0 %414, %v210_v2   ;;  %233 = vperm.xlu1 %416, %v210_v2   ;;  %v217_v7 = vshrl.u32 %v216_v6, 7  ;;  %v209_v10 = vld [vmem:[%s177_s21] sm:$0xf] }
  0x28   : > { %s646_s15 = smov (!%p202_p7, %s490_s15), 1 }
  0x29   : > { %v218_v8 = vsub.s32 0, %v217_v7  ;;  %v228_v9 = vsub.s32 1, %v217_v7  ;;  %v238_v12 = vsub.s32 2, %v217_v7  ;;  %v248_v14 = vsub.s32 3, %v217_v7  ;;  %s352_s23 = sshll.u32 %s646_s15, 2 }
  0x2a   : > { %s208_s30 = scalar_lea.vmem %s634_s3, %s352_s23 }
  0x2b   : > { %415 = vset.pattern.permute.xlu0 %v503_v3  ;;  %417 = vset.pattern.permute.xlu1 %v504_v4  ;;  %v219_v15 = vrot.slane %v209_v10, %v218_v8  ;;  %v229_v16 = vrot.slane %v209_v10, %v228_v9  ;;  %v239_v17 = vrot.slane %v209_v10, %v238_v12 }
  0x2c   : > { %223 = vperm.xlu0 %415, %v210_v2   ;;  %243 = vperm.xlu1 %417, %v210_v2   ;;  %v249_v18 = vrot.slane %v209_v10, %v248_v14 }
  0x30   : > { %418 = vset.pattern.permute.xlu1 %v501_v0  ;;  %419 = vset.pattern.permute.xlu0 %v501_v0 }
  0x31   : > { %255 = vperm.xlu1 %418, %v252_v5  }
  0xa2   : > { %v214_v11 = vpop.permute.xlu0 %213  ;;  %v234_v13 = vpop.permute.xlu1 %233 }
  0xa3   : > { %v220_v21 = vmul.f32 %v219_v15, %v214_v11  ;;  %v240_v23 = vmul.f32 %v239_v17, %v234_v13 }
  0xa7   : > { %v224_v19 = vpop.permute.xlu0 %223  ;;  %v244_v20 = vpop.permute.xlu1 %243 }
  0xa8   : > { %v230_v22 = vmul.f32 %v229_v16, %v224_v19  ;;  %v250_v25 = vmul.f32 %v249_v18, %v244_v20 }
  0xaa   : > { %v231_v24 = vadd.f32 %v230_v22, %v220_v21 }
  0xac   : > { %v241_v26 = vadd.f32 %v240_v23, %v231_v24  ;;  %v256_v27 = vpop.permute.xlu1 %255 }
  0xae   : > { %v251_v28 = vadd.f32 %v250_v25, %v241_v26 }
  0xb0   : > { %v258_v29 = vadd.f32 %v256_v27, %v251_v28 }
  0xb2   : > { %259 = vst [vmem:[%s208_s30] sm:$0x7] %v258_v29 }
  0xb3 PF: > { %s16_s17 = sadd.s32 1, %s498_s17   ;;  %s638_s12 = smov %s482_s13 }
  0xb4   : > { %p13_p8 = scmp.ge.s32.totalorder %s16_s17, 4   ;;  %s639_s13 = smov %s486_s14 }
  0xb5   : > { %s640_s14 = smov %s574_s24  ;;  %s641_s15 = smov %s494_s16 }
  0xb6   : > { %s642_s16 = smov %s644_s19  ;;  %15 = sbr.rel (!%p13_p8) target bundleno = 4 (0x4), region = 72 }
  0xbb   :  { %285 = vsyncpa [#allocation3], 1 }
  0xbc   :  { %287 = vsyncpa [#allocation3 + $0x1], 1 }

// kernel: tpu_custom_call.1
= control target key start
LH: loop header
LB: loop body
LE: loop exit
PB: predicated region body
PF: predicated region fallthrough
CT: control target
= control target key end

     0   :  { %8 = vsyncpa [#allocation3], 0  ;;  %s631_s0 = inlined_call_operand.hbm [shape: f32[2,4,16], index: 0, kind: input, shape index: {}]   ;;  %s632_s1 = inlined_call_operand.vmem [shape: f32[3,4], index: 1, kind: input, shape index: {}]   ;;  %s633_s2 = inlined_call_operand.vmem [shape: f32[3,1], index: 2, kind: input, shape index: {}]   ;;  %s634_s3 = inlined_call_operand.vmem [shape: f32[2,3,16], index: 3, kind: output, shape index: {}]  }
   0x1   :  { %10 = vsyncpa [#allocation3 + $0x1], 0  ;;  %s525_s12 = smov 0   ;;  %s527_s13 = smov 0  }
   0x2   :  { %s529_s14 = smov 0   ;;  %s531_s15 = smov 0  }
   0x3   :  { %s533_s16 = smov 0   ;;  %s535_s17 = smov 0  }
   0x4 LB: > { %s344_s18 = sadd.s32 4294967295, %s498_s17   ;;  %s28_s19 = sadd.s32 1, %s494_s16  ;;  %s498_s17 = sphi %s535_s17, %s16_s17   ;;  %s494_s16 = sphi %s533_s16, %s642_s16   ;;  %s490_s15 = sphi %s531_s15, %s641_s15   ;;  %s486_s14 = sphi %s529_s14, %s640_s14   ;;  %s482_s13 = sphi %s527_s13, %s639_s13   ;;  %s478_s12 = sphi %s525_s12, %s638_s12  }
   0x5   : > { %p30_p0 = scmp.ge.s32.totalorder %s28_s19, 2  ;;  %s37_s20 = sadd.s32 1, %s486_s14 }
   0x6   : > { %p44_p1 = scmp.ne.s32.totalorder %s486_s14, %s482_s13  ;;  %p45_p2 = scmp.eq.s32.totalorder %s498_s17, 0 }
   0x7   : > { %s644_s19 = smov (%p30_p0, %s28_s19), 0  ;;  %p50_p4 = scmp.ne.s32.totalorder %s482_s13, %s478_s12 }
   0x8   : > { %p561_p3 = por %p45_p2, %p44_p1  ;;  %s32_s22 = ssub.s32 %s494_s16, %s644_s19 }
   0x9   : > { %p51_p5 = scmp.eq.s32.totalorder %s344_s18, 0  ;;  %p35_p6 = scmp.eq.s32.totalorder %s32_s22, 0 }
   0xa   : > { %p361_p8 = scmp.lt.s32.totalorder %s498_s17, 2  ;;  %s150_s25 = sand.u32 1, %s486_s14  }
   0xb   : > { %p568_p7 = por %p51_p5, %p50_p4  ;;  %s349_s26 = sshll.u32 %s494_s16, 6 }
   0xc   : > { %s574_s24 = scalar_select %p35_p6, %s486_s14, %s37_s20  }
   0xd   : > { %s348_s27 = sshll.u32 %s150_s25, 2  ;;  %s160_s30 = scalar_lea.hbm %s631_s0, %s349_s26 }
   0xe   : > { %s154_s4 = scalar_lea.vmem [#allocation2], %s348_s27  ;;  %p583_p9 = pnand %p361_p8, %p561_p3 }
   0xf   : > { %s162_s5 = sshll.u32 %s154_s4, 4  ;;  %p350_p10 = scmp.ge.s32.totalorder %s498_s17, 1  ;;  %s163_s5 = int_to_ptr.vmem [resolvable:$true] %s162_s5 }
  0x10   : > { %p167_p11 = scmp.lt.s32.totalorder %s498_s17, 3  ;;  %s151_s7 = scalar_lea.sflag [#allocation3], %s150_s25 }
  0x11   : > { %p422_p12 = pneg %p583_p9  ;;  %s433_s8 = scalar_lea.vmem %s163_s5, 64 }
  0x12   : > { %p434_p13 = scmp.ne.s32.totalorder %s163_s5, %s433_s8  ;;  %s500_s9 = smov [#allocation2]  }
  0x13   : > { %s438_s10 = sshll.u32 %s500_s9, 4  ;;  %s439_s10 = int_to_ptr.vmem [resolvable:$false] %s438_s10 }
  0x14   : > { %p436_p0 = pnand %p434_p13, %p422_p12  ;;  %s440_s11 = scalar_lea.vmem %s439_s10, 128 }
  0x15   : > { %p441_p2 = scmp.lt.s32.totalorder %s163_s5, %s439_s10  ;;  %p442_p3 = scmp.lt.s32.totalorder %s440_s11, %s433_s8 }
  0x16   : > { %p437_p1 = pneg %p436_p0 }
  0x17   : > { %p443_p4 = por %p442_p3, %p441_p2 }
  0x19   : > { %p444_p5 = pnand %p443_p4, %p437_p1 }
  0x1b   : > { %447 = shalt.err (!%p444_p5)
}
  0x1c   : > { %360 = dma.hbm_to_vmem [thread:$0]  (!%p583_p9), %s160_s30, 64, %s163_s5, %s151_s7  }
  0x1d   : > { %p168_p6 = pnand %p350_p10, %p167_p11 }
  0x1e   : > { %s173_s12 = sand.u32 (!%p168_p6), 1, %s482_s13  }
  0x1f   : > { %171 = sbr.rel (%p168_p6) target bundleno = 179 (0xb3), region = 32  ;;  %s351_s18 = sshll.u32 (!%p168_p6), %s173_s12, 2 }
  0x20   : > { %s174_s20 = scalar_lea.sflag (!%p168_p6), [#allocation3], %s173_s12  ;;  %s177_s21 = scalar_lea.vmem (!%p168_p6), [#allocation2], %s351_s18 }
  0x24   : > { %473 = dma.done.wait (%p568_p7), %s174_s20, 64  }
  0x25   : > { %475 = vsyncadd (%p568_p7), %s174_s20, 4294967232  ;;  %v501_v0 = vmov 0   ;;  %v502_v1 = vmov 2   ;;  %v210_v2 = vld [vmem:[%s632_s1] sm:$0x7]  ;;  %v503_v3 = vmov 1   ;;  %v216_v6 = vlaneseq }
  0x26   : > { %414 = vset.pattern.permute.xlu0 %v501_v0  ;;  %416 = vset.pattern.permute.xlu1 %v502_v1  ;;  %v504_v4 = vmov 3   ;;  %v252_v5 = vld [vmem:[%s633_s2] sm:$0x7]  ;;  %p202_p7 = scmp.lt.s32.totalorder %s490_s15, 1 }
  0x27   : > { %213 = vperm.xlu0 %414, %v210_v2   ;;  %233 = vperm.xlu1 %416, %v210_v2   ;;  %v217_v7 = vshrl.u32 %v216_v6, 7  ;;  %v209_v10 = vld [vmem:[%s177_s21] sm:$0xf] }
  0x28   : > { %s646_s15 = smov (!%p202_p7, %s490_s15), 1 }
  0x29   : > { %v218_v8 = vsub.s32 0, %v217_v7  ;;  %v228_v9 = vsub.s32 1, %v217_v7  ;;  %v238_v12 = vsub.s32 2, %v217_v7  ;;  %v248_v14 = vsub.s32 3, %v217_v7  ;;  %s352_s23 = sshll.u32 %s646_s15, 2 }
  0x2a   : > { %s208_s30 = scalar_lea.vmem %s634_s3, %s352_s23 }
  0x2b   : > { %415 = vset.pattern.permute.xlu0 %v503_v3  ;;  %417 = vset.pattern.permute.xlu1 %v504_v4  ;;  %v219_v15 = vrot.slane %v209_v10, %v218_v8  ;;  %v229_v16 = vrot.slane %v209_v10, %v228_v9  ;;  %v239_v17 = vrot.slane %v209_v10, %v238_v12 }
  0x2c   : > { %223 = vperm.xlu0 %415, %v210_v2   ;;  %243 = vperm.xlu1 %417, %v210_v2   ;;  %v249_v18 = vrot.slane %v209_v10, %v248_v14 }
  0x30   : > { %418 = vset.pattern.permute.xlu1 %v501_v0  ;;  %419 = vset.pattern.permute.xlu0 %v501_v0 }
  0x31   : > { %255 = vperm.xlu1 %418, %v252_v5  }
  0xa2   : > { %v214_v11 = vpop.permute.xlu0 %213  ;;  %v234_v13 = vpop.permute.xlu1 %233 }
  0xa3   : > { %v220_v21 = vmul.f32 %v219_v15, %v214_v11  ;;  %v240_v23 = vmul.f32 %v239_v17, %v234_v13 }
  0xa7   : > { %v224_v19 = vpop.permute.xlu0 %223  ;;  %v244_v20 = vpop.permute.xlu1 %243 }
  0xa8   : > { %v230_v22 = vmul.f32 %v229_v16, %v224_v19  ;;  %v250_v25 = vmul.f32 %v249_v18, %v244_v20 }
  0xaa   : > { %v231_v24 = vadd.f32 %v230_v22, %v220_v21 }
  0xac   : > { %v241_v26 = vadd.f32 %v240_v23, %v231_v24  ;;  %v256_v27 = vpop.permute.xlu1 %255 }
  0xae   : > { %v251_v28 = vadd.f32 %v250_v25, %v241_v26 }
  0xb0   : > { %v258_v29 = vadd.f32 %v256_v27, %v251_v28 }
  0xb2   : > { %259 = vst [vmem:[%s208_s30] sm:$0x7] %v258_v29 }
  0xb3 PF: > { %s16_s17 = sadd.s32 1, %s498_s17   ;;  %s638_s12 = smov %s482_s13 }
  0xb4   : > { %p13_p8 = scmp.ge.s32.totalorder %s16_s17, 4   ;;  %s639_s13 = smov %s486_s14 }
  0xb5   : > { %s640_s14 = smov %s574_s24  ;;  %s641_s15 = smov %s494_s16 }
  0xb6   : > { %s642_s16 = smov %s644_s19  ;;  %15 = sbr.rel (!%p13_p8) target bundleno = 4 (0x4), region = 72 }
  0xbb   :  { %285 = vsyncpa [#allocation3], 1 }
  0xbc   :  { %287 = vsyncpa [#allocation3 + $0x1], 1 }

</bundles_post_ra>
